<compile_context>
chip_gen: v5e
topology: v5e:2x2
jax: 0.10.0
libtpu: 0.0.40
codegen_flags: <defaults>
</compile_context>

<pallas_src>
import functools
import math

import jax
import jax.numpy as jnp
from jax import lax
from jax.experimental import pallas as pl
from jax.experimental.pallas import tpu as pltpu


def cross_attention_kernel(xq_ref, xkv_ref, wq_ref, wkv_ref, wo_ref, bo_ref,
                           o_ref, q_sc, m_sc, l_sc, acc_sc,
                           *, heads: int, dim_head: int):
    """One (batch, q-tile, kv-tile) grid step.

    xq_ref : (1, C, TQ)    bf16  query-token block (lane axis = sequence)
    xkv_ref: (1, C, TK)    bf16  key/value-token block
    wq_ref : (inner, C)    bf16  Q weight, (out, in) layout, softmax scale folded in
    wkv_ref: (2*inner, C)  bf16  fused [K; V] weights, (out, in) layout
    wo_ref : (H, C, D)     bf16  per-head output projection
    bo_ref : (C, 1)        f32   output bias
    o_ref  : (1, C, TQ)    f32   output block (resident across the kv axis)
    q_sc   : (H, D, TQ)    bf16  cached Q for this q-tile (queries on lanes)
    m_sc   : (H, 1, TQ)    f32   online-softmax running max
    l_sc   : (H, 1, TQ)    f32   online-softmax running denominator
    acc_sc : (H, D, TQ)    f32   online-softmax running numerator
    """
    inner = heads * dim_head
    ki = pl.program_id(2)

    @pl.when(ki == 0)
    def _init():
        # Q projection once per q-tile: (inner, C) @ (C, TQ) -> (inner, TQ), then a
        # free leading-dim split to (H, D, TQ).  No transposes.
        q_t = lax.dot_general(wq_ref[...], xq_ref[0],
                              (((1,), (0,)), ((), ())),
                              preferred_element_type=jnp.float32)
        q_sc[...] = q_t.reshape(heads, dim_head, -1).astype(jnp.bfloat16)
        m_sc[...] = jnp.full(m_sc.shape, -jnp.inf, dtype=jnp.float32)
        l_sc[...] = jnp.zeros(l_sc.shape, dtype=jnp.float32)
        acc_sc[...] = jnp.zeros(acc_sc.shape, dtype=jnp.float32)

    # Fused K/V projection for this kv-tile: (2*inner, C) @ (C, TK) -> (2*inner, TK).
    kv_t = lax.dot_general(wkv_ref[...], xkv_ref[0],
                           (((1,), (0,)), ((), ())),
                           preferred_element_type=jnp.float32)
    kv_b = kv_t.astype(jnp.bfloat16)
    k3 = kv_b[:inner].reshape(heads, dim_head, -1)        # (H, D, TK)
    v3 = kv_b[inner:].reshape(heads, dim_head, -1)        # (H, D, TK)

    # Scores, transposed: keys on sublanes, queries on lanes.
    # (H, D, TK) x (H, D, TQ) contracting D -> (H, TK, TQ).  Scale already in Q.
    s = lax.dot_general(k3, q_sc[...],
                        (((1,), (1,)), ((0,), (0,))),
                        preferred_element_type=jnp.float32)

    # Online softmax update.  Reductions are over the sublane (key) axis -> VPU trees.
    m_prev = m_sc[...]
    m_new = jnp.maximum(m_prev, jnp.max(s, axis=1, keepdims=True))     # (H, 1, TQ)
    alpha = jnp.exp(m_prev - m_new)
    p = jnp.exp(s - m_new)                                             # (H, TK, TQ)
    l_sc[...] = alpha * l_sc[...] + jnp.sum(p, axis=1, keepdims=True)
    # (H, D, TK) x (H, TK, TQ) contracting TK -> (H, D, TQ).
    pv = lax.dot_general(v3, p.astype(jnp.bfloat16),
                         (((2,), (1,)), ((0,), (0,))),
                         preferred_element_type=jnp.float32)
    acc_sc[...] = alpha * acc_sc[...] + pv
    m_sc[...] = m_new

    @pl.when(ki == pl.num_programs(2) - 1)
    def _finalize():
        o = acc_sc[...] * pl.reciprocal(l_sc[...], approx=True)        # (H, D, TQ) f32
        # Per-head output projection, heads reduced on the fly:
        # (H, C, D) x (H, D, TQ) contracting D -> (H, C, TQ); sum over H -> (C, TQ).
        yh = lax.dot_general(wo_ref[...], o.astype(jnp.bfloat16),
                             (((2,), (1,)), ((0,), (0,))),
                             preferred_element_type=jnp.float32)
        y = jnp.sum(yh, axis=0) + bo_ref[...]                          # (C, TQ) + (C, 1)
        o_ref[0] = y.astype(o_ref.dtype)


def cross_attention(x_nchw, params, *, heads: int, dim_head: int):
    """x_nchw: (B, C, H, W) float32. Self-attention (context=None, mask=None)."""
    b, c, hh, ww = x_nchw.shape
    n = hh * ww
    inner = heads * dim_head
    scale = dim_head ** (-0.5)

    wq, wk, wv, wo, bo = params  # wq/wk/wv: (C, inner), wo: (inner, C), bo: (C,)

    # Layout: NCHW -> (B, C, N); sequence on the lane axis.  Free reshape, no transpose.
    x = x_nchw.reshape(b, c, n).astype(jnp.bfloat16)

    # Weight prep (wrapper-side, one-time, zero kernel cost):
    #  * fold softmax scale into Q,
    #  * (out, in) orientation so in-kernel projections are canonical (F, C) @ (C, T),
    #  * fuse K and V into one slab,
    #  * per-head (H, C, D) output projection.
    wq_t = (wq * scale).T.astype(jnp.bfloat16)                         # (inner, C)
    wkv_t = jnp.concatenate([wk, wv], axis=1).T.astype(jnp.bfloat16)   # (2*inner, C)
    wo_h = jnp.transpose(wo.reshape(heads, dim_head, c),
                         (0, 2, 1)).astype(jnp.bfloat16)               # (H, C, D)
    bo_c = bo.reshape(c, 1).astype(jnp.float32)                        # (C, 1), f32 add

    # Sequence tiling: 128-wide lane-aligned q/kv tiles when possible, else full N.
    tq = 128 if n % 128 == 0 else n
    tkv = 128 if n % 128 == 0 else n
    grid = (b, n // tq, n // tkv)

    kernel = functools.partial(cross_attention_kernel, heads=heads, dim_head=dim_head)

    out = pl.pallas_call(
        kernel,
        out_shape=jax.ShapeDtypeStruct((b, c, n), jnp.float32),
        grid_spec=pltpu.PrefetchScalarGridSpec(
            num_scalar_prefetch=0,
            grid=grid,
            in_specs=[
                pl.BlockSpec((1, c, tq), lambda bi, qi, ki: (bi, 0, qi)),   # x (queries)
                pl.BlockSpec((1, c, tkv), lambda bi, qi, ki: (bi, 0, ki)),  # x (keys/vals)
                pl.BlockSpec((inner, c), lambda bi, qi, ki: (0, 0)),        # wq (scaled)
                pl.BlockSpec((2 * inner, c), lambda bi, qi, ki: (0, 0)),    # [wk; wv]
                pl.BlockSpec((heads, c, dim_head), lambda bi, qi, ki: (0, 0, 0)),  # wo
                pl.BlockSpec((c, 1), lambda bi, qi, ki: (0, 0)),            # bias
            ],
            out_specs=pl.BlockSpec((1, c, tq), lambda bi, qi, ki: (bi, 0, qi)),
            scratch_shapes=[
                pltpu.VMEM((heads, dim_head, tq), jnp.bfloat16),   # cached Q (lanes = TQ)
                pltpu.VMEM((heads, 1, tq), jnp.float32),           # running max
                pltpu.VMEM((heads, 1, tq), jnp.float32),           # running denominator
                pltpu.VMEM((heads, dim_head, tq), jnp.float32),    # running numerator
            ],
        ),
        compiler_params=pltpu.CompilerParams(
            dimension_semantics=("parallel", "parallel", "arbitrary"),
            vmem_limit_bytes=32 * 1024 * 1024,   # safe on v5e/v6e (128 MiB) and v7x (64 MiB)
        ),
    )(x, x, wq_t, wkv_t, wo_h, bo_c)

    return out.reshape(b, c, hh, ww)


def reference(x_nchw, params, *, heads: int, dim_head: int):
    """Pure-JAX f32 reference mirroring the PyTorch forward (context=None, mask=None)."""
    b, c, hh, ww = x_nchw.shape
    n = hh * ww
    scale = dim_head ** (-0.5)
    wq, wk, wv, wo, bo = params
    x = jnp.transpose(x_nchw, (0, 2, 3, 1)).reshape(b, n, c)
    q = x @ wq
    k = x @ wk
    v = x @ wv

    def split(t):  # b n (h d) -> (b h) n d
        return t.reshape(b, n, heads, dim_head).transpose(0, 2, 1, 3).reshape(
            b * heads, n, dim_head)

    q, k, v = split(q), split(k), split(v)
    sim = jnp.einsum('bid,bjd->bij', q, k) * scale
    attn = jax.nn.softmax(sim, axis=-1)
    out = jnp.einsum('bij,bjd->bid', attn, v)
    out = out.reshape(b, heads, n, dim_head).transpose(0, 2, 1, 3).reshape(
        b, n, heads * dim_head)
    out = out @ wo + bo
    return jnp.transpose(out.reshape(b, hh, ww, c), (0, 3, 1, 2))


if __name__ == "__main__":
    # Small shapes consistent with the module's forward; N = 16*16 = 256 -> two 128 tiles.
    B, C, H, W = 2, 4, 16, 16        # query_dim = C = 4
    HEADS, DIM_HEAD = 2, 8           # inner_dim = 16
    INNER = HEADS * DIM_HEAD

    key = jax.random.PRNGKey(0)
    kx, kq, kk, kv, ko, kb = jax.random.split(key, 6)

    x = jax.random.normal(kx, (B, C, H, W), dtype=jnp.float32)

    # Deterministic parameter init (PyTorch-Linear-like bounds), math layout (in, out).
    def init(k, shape, fan_in):
        bound = 1.0 / math.sqrt(fan_in)
        return jax.random.uniform(k, shape, jnp.float32, -bound, bound)

    wq = init(kq, (C, INNER), C)
    wk = init(kk, (C, INNER), C)
    wv = init(kv, (C, INNER), C)
    wo = init(ko, (INNER, C), INNER)
    bo = init(kb, (C,), INNER)
    params = (wq, wk, wv, wo, bo)
    # Dropout(p=0.0) in to_out is the identity and the optional mask path is unused
    # (forward is exercised with context=None, mask=None), so neither is implemented.

    out = cross_attention(x, params, heads=HEADS, dim_head=DIM_HEAD)
    out = jax.block_until_ready(out)

    ref = reference(x, params, heads=HEADS, dim_head=DIM_HEAD)
    assert out.shape == (B, C, H, W), out.shape
    err = float(jnp.max(jnp.abs(out - ref)))
    # bf16 MXU operands + approx EUP reciprocal => looser tolerance than pure f32.
    assert jnp.allclose(out, ref, atol=2e-2, rtol=2e-2), err

    print("KERNEL_OK")
</pallas_src>

<mosaic_0001>
module attributes {stable_mosaic.version = 11 : i64} {
  func.func @cross_attention_kernel(%arg0: i32, %arg1: i32, %arg2: i32, %arg3: memref<1x4x128xbf16, #tpu.memory_space<vmem>>, %arg4: memref<1x4x128xbf16, #tpu.memory_space<vmem>>, %arg5: memref<16x4xbf16, #tpu.memory_space<vmem>>, %arg6: memref<32x4xbf16, #tpu.memory_space<vmem>>, %arg7: memref<2x4x8xbf16, #tpu.memory_space<vmem>>, %arg8: memref<4x1xf32, #tpu.memory_space<vmem>>, %arg9: memref<1x4x128xf32, #tpu.memory_space<vmem>>, %arg10: memref<2x8x128xbf16, #tpu.memory_space<vmem>>, %arg11: memref<2x1x128xf32, #tpu.memory_space<vmem>>, %arg12: memref<2x1x128xf32, #tpu.memory_space<vmem>>, %arg13: memref<2x8x128xf32, #tpu.memory_space<vmem>>) attributes {dimension_semantics = [#tpu.dimension_semantics<parallel>, #tpu.dimension_semantics<parallel>, #tpu.dimension_semantics<arbitrary>], iteration_bounds = array<i64: 2, 2, 2>, scalar_prefetch = 0 : i64, scratch_operands = 4 : i64, tpu.core_type = #tpu.core_type<tc>, window_params = [{transform_indices = @transform_0, window_bounds = array<i64: 1, 4, 128>}, {transform_indices = @transform_1, window_bounds = array<i64: 1, 4, 128>}, {pipeline_mode = #tpu.pipeline_mode<synchronous>, transform_indices = @transform_2, window_bounds = array<i64: 16, 4>}, {pipeline_mode = #tpu.pipeline_mode<synchronous>, transform_indices = @transform_3, window_bounds = array<i64: 32, 4>}, {pipeline_mode = #tpu.pipeline_mode<synchronous>, transform_indices = @transform_4, window_bounds = array<i64: 2, 4, 8>}, {pipeline_mode = #tpu.pipeline_mode<synchronous>, transform_indices = @transform_5, window_bounds = array<i64: 4, 1>}, {transform_indices = @transform_6, window_bounds = array<i64: 1, 4, 128>}]} {
    %c0_i32 = arith.constant 0 : i32
    %0 = arith.cmpi eq, %arg2, %c0_i32 : i32
    %1 = arith.extui %0 : i1 to i32
    %c0_i32_0 = arith.constant 0 : i32
    %2 = arith.cmpi ne, %1, %c0_i32_0 : i32
    scf.if %2 {
      %c0_31 = arith.constant 0 : index
      %c0_32 = arith.constant 0 : index
      %40 = vector.load %arg5[%c0_31, %c0_32] : memref<16x4xbf16, #tpu.memory_space<vmem>>, vector<16x4xbf16>
      %c0_33 = arith.constant 0 : index
      %c0_34 = arith.constant 0 : index
      %c0_35 = arith.constant 0 : index
      %41 = vector.load %arg3[%c0_33, %c0_34, %c0_35] : memref<1x4x128xbf16, #tpu.memory_space<vmem>>, vector<1x4x128xbf16>
      %42 = vector.shape_cast %41 : vector<1x4x128xbf16> to vector<4x128xbf16>
      %cst_36 = arith.constant dense<0.000000e+00> : vector<16x128xf32>
      %43 = tpu.matmul %40, %42, %cst_36 {dimension_numbers = #tpu.dot_dimension_numbers<[1], [0], [0], [1], [0, 0, 1, 1], [], []>} : vector<16x4xbf16>, vector<4x128xbf16>, vector<16x128xf32> -> vector<16x128xf32>
      %44 = vector.shape_cast %43 : vector<16x128xf32> to vector<2x8x128xf32>
      %45 = arith.truncf %44 : vector<2x8x128xf32> to vector<2x8x128xbf16>
      %c0_37 = arith.constant 0 : index
      %c0_38 = arith.constant 0 : index
      %c0_39 = arith.constant 0 : index
      %46 = vector.load %arg10[%c0_37, %c0_38, %c0_39] : memref<2x8x128xbf16, #tpu.memory_space<vmem>>, vector<2x8x128xbf16>
      tpu.vector_store %arg10[%c0_37, %c0_38, %c0_39], %45 {strides = array<i32>} : memref<2x8x128xbf16, #tpu.memory_space<vmem>>, vector<2x8x128xbf16>,
      %cst_40 = arith.constant 0xFF800000 : f32
      %47 = vector.broadcast %cst_40 : f32 to vector<2x1x128xf32>
      %c0_41 = arith.constant 0 : index
      %c0_42 = arith.constant 0 : index
      %c0_43 = arith.constant 0 : index
      %48 = vector.load %arg11[%c0_41, %c0_42, %c0_43] : memref<2x1x128xf32, #tpu.memory_space<vmem>>, vector<2x1x128xf32>
      tpu.vector_store %arg11[%c0_41, %c0_42, %c0_43], %47 {strides = array<i32>} : memref<2x1x128xf32, #tpu.memory_space<vmem>>, vector<2x1x128xf32>,
      %cst_44 = arith.constant 0.000000e+00 : f32
      %49 = vector.broadcast %cst_44 : f32 to vector<2x1x128xf32>
      %c0_45 = arith.constant 0 : index
      %c0_46 = arith.constant 0 : index
      %c0_47 = arith.constant 0 : index
      %50 = vector.load %arg12[%c0_45, %c0_46, %c0_47] : memref<2x1x128xf32, #tpu.memory_space<vmem>>, vector<2x1x128xf32>
      tpu.vector_store %arg12[%c0_45, %c0_46, %c0_47], %49 {strides = array<i32>} : memref<2x1x128xf32, #tpu.memory_space<vmem>>, vector<2x1x128xf32>,
      %cst_48 = arith.constant 0.000000e+00 : f32
      %51 = vector.broadcast %cst_48 : f32 to vector<2x8x128xf32>
      %c0_49 = arith.constant 0 : index
      %c0_50 = arith.constant 0 : index
      %c0_51 = arith.constant 0 : index
      %52 = vector.load %arg13[%c0_49, %c0_50, %c0_51] : memref<2x8x128xf32, #tpu.memory_space<vmem>>, vector<2x8x128xf32>
      tpu.vector_store %arg13[%c0_49, %c0_50, %c0_51], %51 {strides = array<i32>} : memref<2x8x128xf32, #tpu.memory_space<vmem>>, vector<2x8x128xf32>,
    } else {
    }
    %c0 = arith.constant 0 : index
    %c0_1 = arith.constant 0 : index
    %3 = vector.load %arg6[%c0, %c0_1] : memref<32x4xbf16, #tpu.memory_space<vmem>>, vector<32x4xbf16>
    %c0_2 = arith.constant 0 : index
    %c0_3 = arith.constant 0 : index
    %c0_4 = arith.constant 0 : index
    %4 = vector.load %arg4[%c0_2, %c0_3, %c0_4] : memref<1x4x128xbf16, #tpu.memory_space<vmem>>, vector<1x4x128xbf16>
    %5 = vector.shape_cast %4 : vector<1x4x128xbf16> to vector<4x128xbf16>
    %cst = arith.constant dense<0.000000e+00> : vector<32x128xf32>
    %6 = tpu.matmul %3, %5, %cst {dimension_numbers = #tpu.dot_dimension_numbers<[1], [0], [0], [1], [0, 0, 1, 1], [], []>} : vector<32x4xbf16>, vector<4x128xbf16>, vector<32x128xf32> -> vector<32x128xf32>
    %7 = arith.truncf %6 : vector<32x128xf32> to vector<32x128xbf16>
    %8 = vector.extract_strided_slice %7 {offsets = [0, 0], sizes = [16, 128], strides = [1, 1]} : vector<32x128xbf16> to vector<16x128xbf16>
    %9 = vector.shape_cast %8 : vector<16x128xbf16> to vector<2x8x128xbf16>
    %10 = vector.extract_strided_slice %7 {offsets = [16, 0], sizes = [16, 128], strides = [1, 1]} : vector<32x128xbf16> to vector<16x128xbf16>
    %11 = vector.shape_cast %10 : vector<16x128xbf16> to vector<2x8x128xbf16>
    %c0_5 = arith.constant 0 : index
    %c0_6 = arith.constant 0 : index
    %c0_7 = arith.constant 0 : index
    %12 = vector.load %arg10[%c0_5, %c0_6, %c0_7] : memref<2x8x128xbf16, #tpu.memory_space<vmem>>, vector<2x8x128xbf16>
    %cst_8 = arith.constant dense<0.000000e+00> : vector<2x128x128xf32>
    %13 = tpu.matmul %9, %12, %cst_8 {dimension_numbers = #tpu.dot_dimension_numbers<[1], [1], [2], [2], [0, 0, 0, 2, 1, 2], [0], [0]>} : vector<2x8x128xbf16>, vector<2x8x128xbf16>, vector<2x128x128xf32> -> vector<2x128x128xf32>
    %c0_9 = arith.constant 0 : index
    %c0_10 = arith.constant 0 : index
    %c0_11 = arith.constant 0 : index
    %14 = vector.load %arg11[%c0_9, %c0_10, %c0_11] : memref<2x1x128xf32, #tpu.memory_space<vmem>>, vector<2x1x128xf32>
    %cst_12 = arith.constant dense<0xFF800000> : vector<2x128xf32>
    %15 = vector.multi_reduction <maximumf>, %13, %cst_12 [1] : vector<2x128x128xf32> to vector<2x128xf32>
    %16 = vector.shape_cast %15 : vector<2x128xf32> to vector<2x1x128xf32>
    %17 = arith.maximumf %14, %16 : vector<2x1x128xf32>
    %18 = arith.subf %14, %17 : vector<2x1x128xf32>
    %19 = math.exp %18 : vector<2x1x128xf32>
    %20 = vector.broadcast %17 : vector<2x1x128xf32> to vector<2x128x128xf32>
    %21 = arith.subf %13, %20 : vector<2x128x128xf32>
    %22 = math.exp %21 : vector<2x128x128xf32>
    %c0_13 = arith.constant 0 : index
    %c0_14 = arith.constant 0 : index
    %c0_15 = arith.constant 0 : index
    %23 = vector.load %arg12[%c0_13, %c0_14, %c0_15] : memref<2x1x128xf32, #tpu.memory_space<vmem>>, vector<2x1x128xf32>
    %24 = arith.mulf %19, %23 : vector<2x1x128xf32>
    %cst_16 = arith.constant dense<0.000000e+00> : vector<2x128xf32>
    %25 = vector.multi_reduction <add>, %22, %cst_16 [1] : vector<2x128x128xf32> to vector<2x128xf32>
    %26 = vector.shape_cast %25 : vector<2x128xf32> to vector<2x1x128xf32>
    %27 = arith.addf %24, %26 : vector<2x1x128xf32>
    %c0_17 = arith.constant 0 : index
    %c0_18 = arith.constant 0 : index
    %c0_19 = arith.constant 0 : index
    %28 = vector.load %arg12[%c0_17, %c0_18, %c0_19] : memref<2x1x128xf32, #tpu.memory_space<vmem>>, vector<2x1x128xf32>
    tpu.vector_store %arg12[%c0_17, %c0_18, %c0_19], %27 {strides = array<i32>} : memref<2x1x128xf32, #tpu.memory_space<vmem>>, vector<2x1x128xf32>,
    %29 = arith.truncf %22 : vector<2x128x128xf32> to vector<2x128x128xbf16>
    %cst_20 = arith.constant dense<0.000000e+00> : vector<2x8x128xf32>
    %30 = tpu.matmul %11, %29, %cst_20 {dimension_numbers = #tpu.dot_dimension_numbers<[2], [1], [1], [2], [0, 0, 0, 1, 1, 2], [0], [0]>} : vector<2x8x128xbf16>, vector<2x128x128xbf16>, vector<2x8x128xf32> -> vector<2x8x128xf32>
    %c0_21 = arith.constant 0 : index
    %c0_22 = arith.constant 0 : index
    %c0_23 = arith.constant 0 : index
    %31 = vector.load %arg13[%c0_21, %c0_22, %c0_23] : memref<2x8x128xf32, #tpu.memory_space<vmem>>, vector<2x8x128xf32>
    %32 = vector.broadcast %19 : vector<2x1x128xf32> to vector<2x8x128xf32>
    %33 = arith.mulf %32, %31 : vector<2x8x128xf32>
    %34 = arith.addf %33, %30 : vector<2x8x128xf32>
    %c0_24 = arith.constant 0 : index
    %c0_25 = arith.constant 0 : index
    %c0_26 = arith.constant 0 : index
    %35 = vector.load %arg13[%c0_24, %c0_25, %c0_26] : memref<2x8x128xf32, #tpu.memory_space<vmem>>, vector<2x8x128xf32>
    tpu.vector_store %arg13[%c0_24, %c0_25, %c0_26], %34 {strides = array<i32>} : memref<2x8x128xf32, #tpu.memory_space<vmem>>, vector<2x8x128xf32>,
    %c0_27 = arith.constant 0 : index
    %c0_28 = arith.constant 0 : index
    %c0_29 = arith.constant 0 : index
    %36 = vector.load %arg11[%c0_27, %c0_28, %c0_29] : memref<2x1x128xf32, #tpu.memory_space<vmem>>, vector<2x1x128xf32>
    tpu.vector_store %arg11[%c0_27, %c0_28, %c0_29], %17 {strides = array<i32>} : memref<2x1x128xf32, #tpu.memory_space<vmem>>, vector<2x1x128xf32>,
    %c1_i32 = arith.constant 1 : i32
    %37 = arith.cmpi eq, %arg2, %c1_i32 : i32
    %38 = arith.extui %37 : i1 to i32
    %c0_i32_30 = arith.constant 0 : i32
    %39 = arith.cmpi ne, %38, %c0_i32_30 : i32
    scf.if %39 {
      %c0_31 = arith.constant 0 : index
      %c0_32 = arith.constant 0 : index
      %c0_33 = arith.constant 0 : index
      %40 = vector.load %arg13[%c0_31, %c0_32, %c0_33] : memref<2x8x128xf32, #tpu.memory_space<vmem>>, vector<2x8x128xf32>
      %c0_34 = arith.constant 0 : index
      %c0_35 = arith.constant 0 : index
      %c0_36 = arith.constant 0 : index
      %41 = vector.load %arg12[%c0_34, %c0_35, %c0_36] : memref<2x1x128xf32, #tpu.memory_space<vmem>>, vector<2x1x128xf32>
      %42 = tpu.reciprocal %41 {approx = true} : vector<2x1x128xf32> -> vector<2x1x128xf32>
      %43 = vector.broadcast %42 : vector<2x1x128xf32> to vector<2x8x128xf32>
      %44 = arith.mulf %40, %43 : vector<2x8x128xf32>
      %c0_37 = arith.constant 0 : index
      %c0_38 = arith.constant 0 : index
      %c0_39 = arith.constant 0 : index
      %45 = vector.load %arg7[%c0_37, %c0_38, %c0_39] : memref<2x4x8xbf16, #tpu.memory_space<vmem>>, vector<2x4x8xbf16>
      %46 = arith.truncf %44 : vector<2x8x128xf32> to vector<2x8x128xbf16>
      %cst_40 = arith.constant dense<0.000000e+00> : vector<2x4x128xf32>
      %47 = tpu.matmul %45, %46, %cst_40 {dimension_numbers = #tpu.dot_dimension_numbers<[2], [1], [1], [2], [0, 0, 0, 1, 1, 2], [0], [0]>} : vector<2x4x8xbf16>, vector<2x8x128xbf16>, vector<2x4x128xf32> -> vector<2x4x128xf32>
      %cst_41 = arith.constant dense<0.000000e+00> : vector<4x128xf32>
      %48 = vector.multi_reduction <add>, %47, %cst_41 [0] : vector<2x4x128xf32> to vector<4x128xf32>
      %c0_42 = arith.constant 0 : index
      %c0_43 = arith.constant 0 : index
      %49 = vector.load %arg8[%c0_42, %c0_43] : memref<4x1xf32, #tpu.memory_space<vmem>>, vector<4x1xf32>
      %50 = vector.broadcast %49 : vector<4x1xf32> to vector<4x128xf32>
      %51 = arith.addf %48, %50 : vector<4x128xf32>
      %c0_44 = arith.constant 0 : index
      %c0_45 = arith.constant 0 : index
      %c0_46 = arith.constant 0 : index
      %52 = vector.load %arg9[%c0_44, %c0_45, %c0_46] : memref<1x4x128xf32, #tpu.memory_space<vmem>>, vector<1x4x128xf32>
      %53 = vector.shape_cast %52 : vector<1x4x128xf32> to vector<4x128xf32>
      %54 = vector.shape_cast %51 : vector<4x128xf32> to vector<1x4x128xf32>
      tpu.vector_store %arg9[%c0_44, %c0_45, %c0_46], %54 {strides = array<i32>} : memref<1x4x128xf32, #tpu.memory_space<vmem>>, vector<1x4x128xf32>,
    } else {
    }
    return
  }
  func.func @transform_0(%arg0: i32, %arg1: i32, %arg2: i32) -> (i32, i32, i32) {
    %c0_i32 = arith.constant 0 : i32
    %c0_i32_0 = arith.constant 0 : i32
    return %arg0, %c0_i32, %arg1 : i32, i32, i32
  }
  func.func @transform_1(%arg0: i32, %arg1: i32, %arg2: i32) -> (i32, i32, i32) {
    %c0_i32 = arith.constant 0 : i32
    %c0_i32_0 = arith.constant 0 : i32
    return %arg0, %c0_i32, %arg2 : i32, i32, i32
  }
  func.func @transform_2(%arg0: i32, %arg1: i32, %arg2: i32) -> (i32, i32) {
    %c0_i32 = arith.constant 0 : i32
    %c0_i32_0 = arith.constant 0 : i32
    %c0_i32_1 = arith.constant 0 : i32
    return %c0_i32, %c0_i32_0 : i32, i32
  }
  func.func @transform_3(%arg0: i32, %arg1: i32, %arg2: i32) -> (i32, i32) {
    %c0_i32 = arith.constant 0 : i32
    %c0_i32_0 = arith.constant 0 : i32
    %c0_i32_1 = arith.constant 0 : i32
    return %c0_i32, %c0_i32_0 : i32, i32
  }
  func.func @transform_4(%arg0: i32, %arg1: i32, %arg2: i32) -> (i32, i32, i32) {
    %c0_i32 = arith.constant 0 : i32
    %c0_i32_0 = arith.constant 0 : i32
    %c0_i32_1 = arith.constant 0 : i32
    %c0_i32_2 = arith.constant 0 : i32
    return %c0_i32, %c0_i32_0, %c0_i32_1 : i32, i32, i32
  }
  func.func @transform_5(%arg0: i32, %arg1: i32, %arg2: i32) -> (i32, i32) {
    %c0_i32 = arith.constant 0 : i32
    %c0_i32_0 = arith.constant 0 : i32
    %c0_i32_1 = arith.constant 0 : i32
    return %c0_i32, %c0_i32_0 : i32, i32
  }
  func.func @transform_6(%arg0: i32, %arg1: i32, %arg2: i32) -> (i32, i32, i32) {
    %c0_i32 = arith.constant 0 : i32
    %c0_i32_0 = arith.constant 0 : i32
    return %arg0, %c0_i32, %arg1 : i32, i32, i32
  }
}

</mosaic_0001>

<bundles_post_ra>
// kernel: tpu_custom_call.1
= control target key start
LH: loop header
LB: loop body
LE: loop exit
PB: predicated region body
PF: predicated region fallthrough
CT: control target
= control target key end

     0   :  { %11 = vsyncpa [#allocation7], 0  ;;  %s2038_s0 = inlined_call_operand.vmem [shape: bf16[2,4,256], index: 0, kind: input, shape index: {}]   ;;  %s2039_s1 = inlined_call_operand.vmem [shape: bf16[2,4,256], index: 1, kind: input, shape index: {}]   ;;  %s2040_s2 = inlined_call_operand.vmem [shape: bf16[16,4], index: 2, kind: input, shape index: {}]   ;;  %s2041_s3 = inlined_call_operand.vmem [shape: bf16[32,4], index: 3, kind: input, shape index: {}]   ;;  %s2042_s4 = inlined_call_operand.vmem [shape: bf16[2,4,8], index: 4, kind: input, shape index: {}]   ;;  %s2043_s5 = inlined_call_operand.vmem [shape: f32[4,1], index: 5, kind: input, shape index: {}]   ;;  %s2044_s6 = inlined_call_operand.hbm [shape: f32[2,4,256], index: 6, kind: output, shape index: {}]  }
   0x1   :  { %13 = vsyncpa [#allocation7 + $0x1], 0  ;;  %s1552_s21 = smov 0   ;;  %s1554_s22 = smov 0  }
   0x2   :  { %s1556_s23 = smov 0   ;;  %s1558_s24 = smov 0  }
   0x3   :  { %s1560_s25 = smov 0   ;;  %s1562_s26 = smov 0  }
   0x4   :  { %s1564_s27 = smov 0   ;;  %s1566_s28 = smov 0  }
   0x5   :  { %s1568_s29 = smov 0   ;;  %s1570_s30 = smov 0  }
   0x6 LB: > { %2052 = sst [smem:[#allocation9_spill]] %s1484_s23  ;;  %s1160_s7 = sadd.s32 4294967295, %s1512_s30   ;;  %s1512_s30 = sphi %s1570_s30, %s19_s30   ;;  %s1508_s29 = sphi %s1568_s29, %s2070_s29   ;;  %s1504_s28 = sphi %s1566_s28, %s2069_s28   ;;  %s1500_s27 = sphi %s1564_s27, %s2068_s27   ;;  %s1496_s26 = sphi %s1562_s26, %s2067_s26   ;;  %s1492_s25 = sphi %s1560_s25, %s2066_s25   ;;  %s1488_s24 = sphi %s1558_s24, %s2065_s24   ;;  %s1484_s23 = sphi %s1556_s23, %s2064_s23   ;;  %s1480_s22 = sphi %s1554_s22, %s2072_s22   ;;  %s1476_s21 = sphi %s1552_s21, %s2071_s21  }
   0x7   : > { %2053 = sst [smem:[#allocation10_spill]] %s1500_s27  ;;  %s1161_s8 = sadd.s32 4294967294, %s1512_s30  }
   0x8   : > { %2054 = sst [smem:[#allocation11_spill]] %s1504_s28  ;;  %s31_s9 = sadd.s32 1, %s1500_s27 }
   0x9   : > { %2055 = sst [smem:[#allocation12_spill]] %s1508_s29  ;;  %p32_p0 = scmp.ge.s32.totalorder %s31_s9, 2 }
   0xa   : > { %s34_s10 = sadd.s32 1, %s1504_s28  ;;  %s38_s11 = sadd.s32 1, %s1508_s29 }
   0xb   : > { %p197_p1 = scmp.ne.s32.totalorder %s1484_s23, %s1480_s22  ;;  %s2074_s9 = smov (%p32_p0, %s31_s9), 0 }
   0xc   : > { %2056 = sst [smem:[#allocation13_spill]] %s2074_s9  ;;  %s2076_s10 = smov (!%p32_p0, %s34_s10), %s1504_s28 }
   0xd   : > { %p198_p2 = scmp.eq.s32.totalorder %s1160_s7, 7  ;;  %p203_p3 = scmp.ne.s32.totalorder %s1480_s22, %s1476_s21 }
   0xe   : > { %p36_p4 = scmp.ge.s32.totalorder %s2076_s10, 2  ;;  %p204_p5 = scmp.eq.s32.totalorder %s1161_s8, 7 }
   0xf   : > { %p1614_p6 = por %p198_p2, %p197_p1  ;;  %p1164_p8 = scmp.ge.s32.totalorder %s1512_s30, 1 }
  0x10   : > { %s2078_s10 = smov (%p36_p4, %s2076_s10), 0  ;;  %s2080_s11 = smov (!%p36_p4, %s38_s11), %s1508_s29 }
  0x11   : > { %2058 = sst [smem:[#allocation14_spill]] %s2078_s10  ;;  %p1621_p7 = por %p204_p5, %p203_p3 }
  0x12   : > { %p40_p9 = scmp.ge.s32.totalorder %s2080_s11, 2  ;;  %p256_p10 = scmp.lt.s32.totalorder %s1512_s30, 9 }
  0x13   : > { %s183_s14 = ssub.s32 %s1504_s28, %s2078_s10  ;;  %s187_s17 = sadd.s32 1, %s1484_s23 }
  0x14   : > { %s2082_s11 = smov (%p40_p9, %s2080_s11), 0  ;;  %p257_p11 = pnand %p1164_p8, %p256_p10 }
  0x15   : > { %2060 = sst [smem:[#allocation15_spill]] %s2082_s11  ;;  %s182_s15 = ssub.s32 %s1508_s29, %s2082_s11 }
  0x16   : > { %s184_s16 = sor.u32 %s183_s14, %s182_s15  ;;  %s2050_s19 = sand.u32 (!%p257_p11), 1, %s1480_s22  }
  0x17   : > { %p185_p12 = scmp.eq.s32.totalorder %s184_s16, 0  ;;  %260 = sbr.rel (%p257_p11) target bundleno = 1157 (0x485), region = 44 }
  0x18   : > { %p297_p13 = scmp.lt.s32.totalorder (!%p257_p11), %s1496_s26, 1  ;;  %s1641_s20 = sshll.u32 (!%p257_p11), %s2050_s19, 2 }
  0x19   : > { %s1635_s18 = scalar_select %p185_p12, %s1484_s23, %s187_s17  }
  0x1a   : > { %p299_p0 = scmp.lt.s32.totalorder (!%p257_p11), %s1492_s25, 1  ;;  %p307_p1 = scmp.lt.s32.totalorder (!%p257_p11), %s1488_s24, 1 }
  0x1b   : > { %2061 = sst [smem:[#allocation16_spill]] %s1635_s18  ;;  %s296_s23 = scalar_lea.vmem (!%p257_p11), [#allocation6], %s1641_s20 }
  0x1c   : > { %s298_s7 = scalar_select %p297_p13, %s1496_s26, 1 }
  0x1d   : > { %s300_s8 = scalar_select %p299_p0, %s1492_s25, 1 }
  0x1e   : > { %s1166_s14 = sshll.u32 %s298_s7, 1  ;;  %p1170_p2 = scmp.ne.s32.totalorder %s1488_s24, 0 }
  0x1f   : > { %s302_s15 = sadd.s32 %s1166_s14, %s300_s8 }
  0x20   : > { %s1167_s16 = sshll.u32 %s302_s15, 1 }
  0x21   : > { %s304_s10 = scalar_lea.vmem %s2038_s0, %s1167_s16 }
  0x22   : > { %s308_s9 = scalar_select %p307_p1, %s1488_s24, 1 }
  0x23   : > { %317 = sbr.rel (%p1170_p2) target bundleno = 182 (0xb6), region = 48 }
  0x24   : > { %s310_s29 = sadd.s32 %s1166_s14, %s308_s9 }
  0x25   : > { %s1169_s28 = sshll.u32 %s310_s29, 1 }
  0x26   : > { %s312_s19 = scalar_lea.vmem %s2039_s1, %s1169_s28 }
  0x28   : > { %v320_v0 = vld [vmem:[%s304_s10] sm:$0x3]  ;;  %vm330_vm0 = vcmask 1041408   ;;  %vm326_vm1 = vcmask 31744   ;;  %v1514_v3 = vmov -inf   ;;  %v1515_v4 = vmov 0.0  }
  0x29   : > { %v332_v1 = vsel %vm330_vm0, %v320_v0, 0  ;;  %v1210_v2 = vld [vmem:[%s2040_s2] sm:$0xff]  ;;  %352 = vst [vmem:[#allocation3] sm:$0x1] %v1514_v3 }
  0x2a   : > { %341 = vmatpush.bf16.msra.mxu0 %v332_v1  ;;  %353 = vst [vmem:[#allocation3 + $0x1] sm:$0x1] %v1514_v3 }
  0x2b   : > { %354 = vst [vmem:[#allocation4] sm:$0x1] %v1515_v4 }
  0x2c   : > { %355 = vst [vmem:[#allocation4 + $0x1] sm:$0x1] %v1515_v4 }
  0x2d   : > { %1175 = vmatmul.msk.bf16.vlgmr.msra.gmra.mxu0 %vm326_vm1, %v1210_v2  ;;  %356 = vst [vmem:[#allocation5] sm:$0xff] %v1515_v4 }
  0x2e   : > { %357 = vst [vmem:[#allocation5 + $0x8] sm:$0xff] %v1515_v4 }
  0xaa   : > { %v343_v5 = vpop.f32.mrf.mxu0 }
  0xb2   : > { %v345_v6 = vpop.f32.mrf.mxu0 }
  0xb3   : > { %v1216_v7 = vpack.c.bf16 %v345_v6, %v343_v5 }
  0xb5   : > { %1217 = vst [vmem:[#allocation2] sm:$0xff] %v1216_v7  }
  0xb6 PF: > { %v362_v8 = vld [vmem:[%s312_s19] sm:$0x3]  ;;  %vm380_vm2 = vcmask 1041408   ;;  %vm373_vm3 = vcmask 31744   ;;  %vm450_vm4 = vcmask 1043456   ;;  %vm425_vm5 = vcmask 64512  }
  0xb7   : > { %v382_v9 = vsel %vm380_vm2, %v362_v8, 0  ;;  %v1211_v10 = vld [vmem:[%s2041_s3] sm:$0xff]  ;;  %v1212_v23 = vld [vmem:[%s2041_s3 + $0x8] sm:$0xff]  ;;  %p1202_p3 = scmp.ne.s32.totalorder %s1488_s24, 1 }
  0xb8   : > { %391 = vmatpush.bf16.msra.mxu0 %v382_v9  ;;  %1218 = vmatpush.bf16.msra.mxu3 %v382_v9 }
  0xbb   : > { %1184 = vmatmul.msk.bf16.vlgmr.msra.gmra.mxu0 %vm373_vm3, %v1211_v10  ;;  %1185 = vmatmul.msk.bf16.vlgmr.msra.gmra.mxu3 %vm373_vm3, %v1212_v23 }
  0xbc   : > { %v408_v11 = vld [vmem:[#allocation2 + $0x4] sm:$0xf]  ;;  %v407_v17 = vld [vmem:[#allocation2] sm:$0xf] }
  0xbd   : > { %v544_v12 = vsel %vm450_vm4, %v408_v11, 0  ;;  %v452_v18 = vsel %vm450_vm4, %v407_v17, 0 }
  0xbe   : > { %553 = vmatpush.bf16.msrb.mxu0 %v544_v12  ;;  %1220 = vmatpush.bf16.msra.mxu2 %v544_v12 }
  0xbf   : > { %461 = vmatpush.bf16.msra.mxu1 %v452_v18  ;;  %1219 = vmatpush.bf16.msrb.mxu3 %v452_v18 }
 0x138   : > { %v393_v13 = vpop.f32.mrf.mxu0 }
 0x139   : > { %v403_v15 = vpack.c.bf16 %v393_v13, %v393_v13 }
 0x13e   : > { %v1705_v46 = vpop.f32.mrf.mxu3 }
 0x140   : > { %v395_v14 = vpop.f32.mrf.mxu0 }
 0x141   : > { %v404_v16 = vpack.c.bf16 %v395_v14, %v395_v14 }
 0x143   : > { %1312 = vxpose.binary.xlu0.c.b16.start.end [1/2] (short) %v403_v15, %v404_v16, 128 }
 0x146   : > { %v1713_v50 = vpop.f32.mrf.mxu3 }
 0x1ef   : > { %v1313_v19 = vpop.trf.xlu0 }
 0x1f0   : > { %1194 = vmatmul.msk.bf16.vlgmr.msrb.gmra.mxu0 %vm425_vm5, %v1313_v19 }
 0x1f7   : > { %v1314_v20 = vpop.trf.xlu0 }
 0x1f8   : > { %1186 = vmatmul.msk.bf16.vlgmr.msra.gmra.mxu1 %vm425_vm5, %v1314_v20 }
 0x1ff   : > { %v1315_v21 = vpop.trf.xlu0 }
 0x200   : > { %1195 = vmatmul.msk.bf16.gmra.mxu0 %vm425_vm5, %v1315_v21 }
 0x207   : > { %v1316_v22 = vpop.trf.xlu0 }
 0x208   : > { %1187 = vmatmul.msk.bf16.gmra.mxu1 %vm425_vm5, %v1316_v22 }
 0x20f   : > { %v1317_v24 = vpop.trf.xlu0 }
 0x210   : > { %1196 = vmatmul.msk.bf16.gmra.mxu0 %vm425_vm5, %v1317_v24 }
 0x217   : > { %v1318_v25 = vpop.trf.xlu0 }
 0x218   : > { %1188 = vmatmul.msk.bf16.gmra.mxu1 %vm425_vm5, %v1318_v25 }
 0x21f   : > { %v1319_v26 = vpop.trf.xlu0 }
 0x220   : > { %1197 = vmatmul.msk.bf16.vlgmr.msra.gmra.mxu2 %vm425_vm5, %v1319_v26 }
 0x227   : > { %v1320_v27 = vpop.trf.xlu0 }
 0x228   : > { %1189 = vmatmul.msk.bf16.gmra.mxu1 %vm425_vm5, %v1320_v27 }
 0x22f   : > { %v1321_v28 = vpop.trf.xlu0 }
 0x230   : > { %1198 = vmatmul.msk.bf16.gmra.mxu2 %vm425_vm5, %v1321_v28 }
 0x237   : > { %v1322_v29 = vpop.trf.xlu0 }
 0x238   : > { %1190 = vmatmul.msk.bf16.gmra.mxu1 %vm425_vm5, %v1322_v29 }
 0x23f   : > { %v1323_v30 = vpop.trf.xlu0 }
 0x240   : > { %1199 = vmatmul.msk.bf16.gmra.mxu2 %vm425_vm5, %v1323_v30 }
 0x247   : > { %v1324_v31 = vpop.trf.xlu0 }
 0x248   : > { %1191 = vmatmul.msk.bf16.vlgmr.msrb.gmra.mxu3 %vm425_vm5, %v1324_v31 }
 0x24f   : > { %v1325_v32 = vpop.trf.xlu0 }
 0x250   : > { %1200 = vmatmul.msk.bf16.gmra.mxu2 %vm425_vm5, %v1325_v32 }
 0x257   : > { %v1326_v33 = vpop.trf.xlu0 }
 0x258   : > { %1192 = vmatmul.msk.bf16.gmra.mxu3 %vm425_vm5, %v1326_v33 }
 0x25f   : > { %v1327_v34 = vpop.trf.xlu0 }
 0x260   : > { %1201 = vmatmul.msk.bf16.gmra.mxu2 %vm425_vm5, %v1327_v34 }
 0x267   : > { %v1328_v35 = vpop.trf.xlu0 }
 0x268   : > { %1193 = vmatmul.msk.bf16.gmra.mxu3 %vm425_vm5, %v1328_v35 }
 0x26d   : > { %v1695_v41 = vpop.f32.mrf.mxu0 }
 0x275   : > { %v1685_v36 = vpop.f32.mrf.mxu1  ;;  %v1701_v44 = vpop.f32.mrf.mxu0 }
 0x27d   : > { %v1687_v37 = vpop.f32.mrf.mxu1  ;;  %v1709_v48 = vpop.f32.mrf.mxu0 }
 0x27e   : > { %v618_v63 = vmax.f32 %v1695_v41, %v1709_v48 }
 0x285   : > { %v1691_v39 = vpop.f32.mrf.mxu1  ;;  %v1717_v52 = vpop.f32.mrf.mxu0 }
 0x286   : > { %v619_v0 = vmax.f32 %v1701_v44, %v1717_v52  ;;  %v597_v10 = vmax.f32 %v1685_v36, %v1691_v39 }
 0x28d   : > { %v1697_v42 = vpop.f32.mrf.mxu1  ;;  %v1729_v58 = vpop.f32.mrf.mxu0 }
 0x28e   : > { %v620_v2 = vmax.f32 %v618_v63, %v1729_v58  ;;  %v598_v11 = vmax.f32 %v1687_v37, %v1697_v42 }
 0x295   : > { %v1703_v45 = vpop.f32.mrf.mxu1  ;;  %v1737_v62 = vpop.f32.mrf.mxu0 }
 0x296   : > { %v621_v3 = vmax.f32 %v619_v0, %v1737_v62  ;;  %v599_v14 = vmax.f32 %v597_v10, %v1703_v45 }
 0x29d   : > { %v1711_v49 = vpop.f32.mrf.mxu1 }
 0x29e   : > { %v600_v15 = vmax.f32 %v598_v11, %v1711_v49 }
 0x2a3   : > { %v1689_v38 = vpop.f32.mrf.mxu2 }
 0x2a4   : > { %v622_v6 = vmax.f32 %v620_v2, %v1689_v38 }
 0x2a5   : > { %v1723_v55 = vpop.f32.mrf.mxu1 }
 0x2a6   : > { %v601_v21 = vmax.f32 %v599_v14, %v1723_v55 }
 0x2ab   : > { %v1693_v40 = vpop.f32.mrf.mxu2 }
 0x2ac   : > { %v623_v7 = vmax.f32 %v621_v3, %v1693_v40 }
 0x2ad   : > { %v1731_v59 = vpop.f32.mrf.mxu1 }
 0x2ae   : > { %v602_v22 = vmax.f32 %v600_v15, %v1731_v59 }
 0x2b3   : > { %v1699_v43 = vpop.f32.mrf.mxu2 }
 0x2b4   : > { %v624_v8 = vmax.f32 %v622_v6, %v1699_v43 }
 0x2b5   : > { %v1743_v1 = vpop.f32.mrf.mxu1 }
 0x2b6   : > { %v603_v25 = vmax.f32 %v601_v21, %v1743_v1 }
 0x2bb   : > { %v1707_v47 = vpop.f32.mrf.mxu2 }
 0x2bc   : > { %v625_v9 = vmax.f32 %v623_v7, %v1707_v47  ;;  %v1785_v7 = vld [vmem:[#allocation3 + $0x1] sm:$0x1] }
 0x2bd   : > { %v1763_v16 = vpop.f32.mrf.mxu1 }
 0x2be   : > { %v604_v26 = vmax.f32 %v602_v22, %v1763_v16 }
 0x2c3   : > { %v1715_v51 = vpop.f32.mrf.mxu2 }
 0x2c4   : > { %v626_v12 = vmax.f32 %v624_v8, %v1715_v51 }
 0x2cb   : > { %v1719_v53 = vpop.f32.mrf.mxu3  ;;  %v1721_v54 = vpop.f32.mrf.mxu2 }
 0x2cc   : > { %v627_v13 = vmax.f32 %v625_v9, %v1721_v54  ;;  %v605_v28 = vmax.f32 %v603_v25, %v1719_v53 }
 0x2d3   : > { %v1725_v56 = vpop.f32.mrf.mxu3  ;;  %v1727_v57 = vpop.f32.mrf.mxu2 }
 0x2d4   : > { %v628_v17 = vmax.f32 %v626_v12, %v1727_v57  ;;  %v606_v29 = vmax.f32 %v604_v26, %v1725_v56 }
 0x2db   : > { %v1733_v60 = vpop.f32.mrf.mxu3  ;;  %v1735_v61 = vpop.f32.mrf.mxu2 }
 0x2dc   : > { %v629_v18 = vmax.f32 %v627_v13, %v1735_v61  ;;  %v607_v31 = vmax.f32 %v605_v28, %v1733_v60 }
 0x2e3   : > { %v1747_v4 = vpop.f32.mrf.mxu3  ;;  %v1749_v5 = vpop.f32.mrf.mxu2 }
 0x2e4   : > { %v630_v23 = vmax.f32 %v628_v17, %v1749_v5  ;;  %v608_v32 = vmax.f32 %v606_v29, %v1747_v4 }
 0x2eb   : > { %v1767_v19 = vpop.f32.mrf.mxu3  ;;  %v1769_v20 = vpop.f32.mrf.mxu2 }
 0x2ec   : > { %v631_v24 = vmax.f32 %v629_v18, %v1769_v20  ;;  %v609_v35 = vmax.f32 %v607_v31, %v1767_v19 }
 0x2ee   : > { %v632_v27 = vmax.f32 %v630_v23, %v631_v24 }
 0x2f0   : > { %v633_v30 = vrot.slane %v632_v27, 4 }
 0x2f2   : > { %v634_v33 = vmax.f32 %v632_v27, %v633_v30 }
 0x2f3   : > { %v1781_v34 = vpop.f32.mrf.mxu3 }
 0x2f4   : > { %v635_v63 = vrot.slane %v634_v33, 2  ;;  %v610_v0 = vmax.f32 %v608_v32, %v1781_v34 }
 0x2f6   : > { %v636_v2 = vmax.f32 %v634_v33, %v635_v63  ;;  %v611_v3 = vmax.f32 %v609_v35, %v610_v0 }
 0x2f8   : > { %v637_v6 = vrot.slane %v636_v2, 1  ;;  %v612_v8 = vrot.slane %v611_v3, 4 }
 0x2fa   : > { %v638_v9 = vmax.f32 %v636_v2, %v637_v6  ;;  %v613_v11 = vmax.f32 %v611_v3, %v612_v8 }
 0x2fc   : > { %v1788_v10 = vmax.f32 %v1785_v7, %v638_v9  ;;  %v614_v18 = vrot.slane %v613_v11, 2 }
 0x2fe   : > { %v650_v12 = vperm.slane %v1788_v10, 0  ;;  %968 = vst [vmem:[#allocation3 + $0x1] sm:$0x1] %v1788_v10 }
 0x300   : > { %v669_v13 = vsub.f32 %v1695_v41, %v650_v12  ;;  %v670_v14 = vsub.f32 %v1701_v44, %v650_v12  ;;  %v671_v15 = vsub.f32 %v1709_v48, %v650_v12  ;;  %v672_v17 = vsub.f32 %v1717_v52, %v650_v12 }
 0x301   : > { %v673_v21 = vsub.f32 %v1729_v58, %v650_v12  ;;  %v674_v22 = vsub.f32 %v1737_v62, %v650_v12  ;;  %v675_v23 = vsub.f32 %v1689_v38, %v650_v12  ;;  %v676_v27 = vsub.f32 %v1693_v40, %v650_v12 }
 0x302   : > { %v717_v24 = vmul.f32 1.442695, %v669_v13  ;;  %v719_v25 = vmul.f32 1.442695, %v670_v14  ;;  %v721_v26 = vmul.f32 1.442695, %v671_v15  ;;  %v615_v41 = vmax.f32 %v613_v11, %v614_v18 }
 0x303   : > { %v723_v28 = vmul.f32 1.442695, %v672_v17  ;;  %v677_v44 = vsub.f32 %v1699_v43, %v650_v12  ;;  %v725_v48 = vmul.f32 1.442695, %v673_v21  ;;  %v678_v52 = vsub.f32 %v1707_v47, %v650_v12  ;;  %v1805_v43 = vld [vmem:[#allocation3] sm:$0x1] }
 0x304   : > { %1329 = vpow2.f32 %v717_v24  ;;  %v727_v29 = vmul.f32 1.442695, %v674_v22  ;;  %v679_v58 = vsub.f32 %v1715_v51, %v650_v12  ;;  %v729_v62 = vmul.f32 1.442695, %v675_v23 }
 0x305   : > { %1331 = vpow2.f32 %v719_v25  ;;  %v680_v38 = vsub.f32 %v1721_v54, %v650_v12  ;;  %v731_v30 = vmul.f32 1.442695, %v676_v27  ;;  %v616_v31 = vrot.slane %v615_v41, 1 }
 0x306   : > { %1333 = vpow2.f32 %v721_v26  ;;  %v681_v40 = vsub.f32 %v1727_v57, %v650_v12  ;;  %v733_v32 = vmul.f32 1.442695, %v677_v44  ;;  %v682_v33 = vsub.f32 %v1735_v61, %v650_v12 }
 0x307   : > { %1335 = vpow2.f32 %v723_v28  ;;  %v735_v47 = vmul.f32 1.442695, %v678_v52  ;;  %v617_v35 = vmax.f32 %v615_v41, %v616_v31  ;;  %v683_v51 = vsub.f32 %v1749_v5, %v650_v12 }
 0x308   : > { %1337 = vpow2.f32 %v725_v48  ;;  %v737_v54 = vmul.f32 1.442695, %v679_v58  ;;  %v684_v2 = vsub.f32 %v1769_v20, %v650_v12  ;;  %v739_v57 = vmul.f32 1.442695, %v680_v38 }
 0x309   : > { %1339 = vpow2.f32 %v727_v29  ;;  %v1815_v3 = vmax.f32 %v1805_v43, %v617_v35  ;;  %v741_v61 = vmul.f32 1.442695, %v681_v40  ;;  %v743_v5 = vmul.f32 1.442695, %v682_v33 }
 0x30a   : > { %v1808_v63 = vpop.eup %1329  ;;  %1341 = vpow2.f32 %v729_v62  ;;  %v745_v12 = vmul.f32 1.442695, %v683_v51  ;;  %v747_v15 = vmul.f32 1.442695, %v684_v2 }
 0x30b   : > { %v1811_v0 = vpop.eup %1331  ;;  %1343 = vpow2.f32 %v731_v30  ;;  %v1824_v11 = vperm.slane %v1815_v3, 0  ;;  %967 = vst [vmem:[#allocation3] sm:$0x1] %v1815_v3 }
 0x30c   : > { %v1817_v6 = vpop.eup %1333  ;;  %1345 = vpow2.f32 %v733_v32  ;;  %v774_v8 = vadd.f32 %v1811_v0, %v1808_v63 }
 0x30d   : > { %v1821_v9 = vpop.eup %1335  ;;  %1347 = vpow2.f32 %v735_v47  ;;  %v653_v22 = vsub.f32 %v1685_v36, %v1824_v11  ;;  %v654_v23 = vsub.f32 %v1687_v37, %v1824_v11  ;;  %v655_v24 = vsub.f32 %v1691_v39, %v1824_v11 }
 0x30e   : > { %v1827_v20 = vpop.eup %1337  ;;  %1349 = vpow2.f32 %v737_v54  ;;  %v775_v13 = vadd.f32 %v1817_v6, %v774_v8  ;;  %v656_v27 = vsub.f32 %v1697_v42, %v1824_v11  ;;  %v657_v36 = vsub.f32 %v1703_v45, %v1824_v11 }
 0x30f   : > { %v1830_v14 = vpop.eup %1339  ;;  %1351 = vpow2.f32 %v739_v57  ;;  %v658_v37 = vsub.f32 %v1711_v49, %v1824_v11  ;;  %v659_v39 = vsub.f32 %v1723_v55, %v1824_v11  ;;  %v660_v48 = vsub.f32 %v1731_v59, %v1824_v11 }
 0x310   : > { %v1832_v17 = vpop.eup %1341  ;;  %1353 = vpow2.f32 %v741_v61  ;;  %v776_v18 = vadd.f32 %v1821_v9, %v775_v13  ;;  %v661_v42 = vsub.f32 %v1743_v1, %v1824_v11  ;;  %v663_v52 = vsub.f32 %v1719_v53, %v1824_v11 }
 0x311   : > { %v1835_v21 = vpop.eup %1343  ;;  %1355 = vpow2.f32 %v743_v5  ;;  %v664_v45 = vsub.f32 %v1725_v56, %v1824_v11  ;;  %v685_v49 = vmul.f32 1.442695, %v653_v22  ;;  %v687_v58 = vmul.f32 1.442695, %v654_v23 }
 0x312   : > { %v1843_v25 = vpop.eup %1345  ;;  %1357 = vpow2.f32 %v745_v12  ;;  %v777_v26 = vadd.f32 %v1827_v20, %v776_v18  ;;  %v689_v62 = vmul.f32 1.442695, %v655_v24  ;;  %v665_v30 = vsub.f32 %v1733_v60, %v1824_v11 }
 0x313   : > { %v1848_v28 = vpop.eup %1347  ;;  %1359 = vpow2.f32 %v747_v15  ;;  %v666_v59 = vsub.f32 %v1747_v4, %v1824_v11  ;;  %v691_v1 = vmul.f32 1.442695, %v656_v27  ;;  %v667_v53 = vsub.f32 %v1767_v19, %v1824_v11 }
 0x314   : > { %v1350_v41 = vpop.eup %1349  ;;  %v778_v44 = vadd.f32 %v1830_v14, %v777_v26  ;;  %v668_v56 = vsub.f32 %v1781_v34, %v1824_v11  ;;  %1361 = vpow2.f32 %v685_v49  ;;  %v693_v40 = vmul.f32 1.442695, %v657_v36 }
 0x315   : > { %v1352_v29 = vpop.eup %1351  ;;  %1363 = vpow2.f32 %v687_v58  ;;  %v695_v60 = vmul.f32 1.442695, %v658_v37  ;;  %v825_v47 = vpack.c.bf16 %v1350_v41, %v1350_v41  ;;  %v697_v4 = vmul.f32 1.442695, %v659_v39 }
 0x316   : > { %v1354_v55 = vpop.eup %1353  ;;  %v779_v38 = vadd.f32 %v1832_v17, %v778_v44  ;;  %1365 = vpow2.f32 %v689_v62  ;;  %v699_v51 = vmul.f32 1.442695, %v660_v48  ;;  %v701_v54 = vmul.f32 1.442695, %v661_v42 }
 0x317   : > { %v1870_v31 = vpop.eup %1355  ;;  %1367 = vpow2.f32 %v691_v1  ;;  %v705_v2 = vmul.f32 1.442695, %v663_v52  ;;  %v707_v57 = vmul.f32 1.442695, %v664_v45  ;;  %v827_v8 = vpack.c.bf16 %v1354_v55, %v1354_v55 }
 0x318   : > { %v1876_v32 = vpop.eup %1357  ;;  %v780_v33 = vadd.f32 %v1835_v21, %v779_v38  ;;  %1369 = vpow2.f32 %v693_v40  ;;  %v828_v13 = vpack.c.bf16 %v1870_v31, %v1870_v31  ;;  %v709_v18 = vmul.f32 1.442695, %v665_v30 }
 0x319   : > { %v1879_v35 = vpop.eup %1359  ;;  %v829_v61 = vpack.c.bf16 %v1876_v32, %v1876_v32  ;;  %1371 = vpow2.f32 %v695_v60  ;;  %v826_v23 = vpack.c.bf16 %v1352_v29, %v1352_v29  ;;  %v920_v27 = vunpack.c.l.b16 %v827_v8 }
 0x31a   : > { %v781_v19 = vadd.f32 %v1843_v25, %v780_v33  ;;  %v830_v34 = vpack.c.bf16 %v1879_v35, %v1879_v35  ;;  %v1889_v15 = vpop.eup %1361  ;;  %1373 = vpow2.f32 %v697_v4  ;;  %v918_v36 = vunpack.c.l.b16 %v825_v47 }
 0x31b   : > { %v922_v22 = vunpack.c.l.b16 %v829_v61  ;;  %v1891_v24 = vpop.eup %1363  ;;  %1375 = vpow2.f32 %v699_v51  ;;  %v921_v48 = vunpack.c.l.b16 %v828_v13  ;;  %v919_v42 = vunpack.c.l.b16 %v826_v23 }
 0x31c   : > { %v782_v5 = vadd.f32 %v1848_v28, %v781_v19  ;;  %v923_v12 = vunpack.c.l.b16 %v830_v34  ;;  %v1893_v37 = vpop.eup %1365  ;;  %v753_v39 = vadd.f32 %v1891_v24, %v1889_v15  ;;  %v662_v49 = vsub.f32 %v1763_v16, %v1824_v11 }
 0x31d   : > { %v1897_v52 = vpop.eup %1367  ;;  %1377 = vpow2.f32 %v701_v54  ;;  %v711_v58 = vmul.f32 1.442695, %v666_v59  ;;  %v713_v62 = vmul.f32 1.442695, %v667_v53  ;;  %v929_v30 = vpack.c.b16 %v919_v42, %v918_v36 }
 0x31e   : > { %v783_v26 = vadd.f32 %v1350_v41, %v782_v5  ;;  %v931_v44 = vpack.c.b16 %v923_v12, %v922_v22  ;;  %v1901_v41 = vpop.eup %1369  ;;  %1379 = vpow2.f32 %v705_v2  ;;  %v754_v38 = vadd.f32 %v1893_v37, %v753_v39 }
 0x31f   : > { %v1904_v1 = vpop.eup %1371  ;;  %1381 = vpow2.f32 %v707_v57  ;;  %v715_v33 = vmul.f32 1.442695, %v668_v56  ;;  %v930_v11 = vpack.c.b16 %v921_v48, %v920_v27  ;;  %v824_v59 = vpack.c.bf16 %v1848_v28, %v1848_v28 }
 0x320   : > { %v784_v45 = vadd.f32 %v1352_v29, %v783_v26  ;;  %940 = vmatpush.bf16.msra.mxu0 %v931_v44  ;;  %v823_v29 = vpack.c.bf16 %v1843_v25, %v1843_v25  ;;  %v1908_v60 = vpop.eup %1373  ;;  %1383 = vpow2.f32 %v709_v18  ;;  %v755_v16 = vadd.f32 %v1897_v52, %v754_v38 }
 0x321   : > { %v1913_v53 = vpop.eup %1375  ;;  %v703_v4 = vmul.f32 1.442695, %v662_v49  ;;  %1385 = vpow2.f32 %v711_v58  ;;  %v917_v28 = vunpack.c.l.b16 %v824_v59  ;;  %v821_v34 = vpack.c.bf16 %v1832_v17, %v1832_v17 }
 0x322   : > { %v785_v40 = vadd.f32 %v1354_v55, %v784_v45  ;;  %1387 = vpow2.f32 %v713_v62  ;;  %v756_v55 = vadd.f32 %v1901_v41, %v755_v16  ;;  %v916_v51 = vunpack.c.l.b16 %v823_v29 }
 0x323   : > { %v1917_v25 = vpop.eup %1377  ;;  %1389 = vpow2.f32 %v715_v33  ;;  %v819_v12 = vpack.c.bf16 %v1827_v20, %v1827_v20  ;;  %v820_v13 = vpack.c.bf16 %v1830_v14, %v1830_v14  ;;  %v914_v22 = vunpack.c.l.b16 %v821_v34 }
 0x324   : > { %v786_v47 = vadd.f32 %v1870_v31, %v785_v40  ;;  %941 = vmatpush.bf16.msra.mxu0 %v930_v11  ;;  %v1380_v54 = vpop.eup %1379  ;;  %v757_v19 = vadd.f32 %v1904_v1, %v756_v55  ;;  %v822_v31 = vpack.c.bf16 %v1835_v21, %v1835_v21  ;;  %1391 = vpow2.f32 %v703_v4 }
 0x325   : > { %v1382_v2 = vpop.eup %1381  ;;  %v928_v21 = vpack.c.b16 %v917_v28, %v916_v51  ;;  %v817_v36 = vpack.c.bf16 %v1817_v6, %v1817_v6  ;;  %v642_v39 = vsub.f32 %v1785_v7, %v1788_v10  ;;  %v912_v58 = vunpack.c.l.b16 %v819_v12 }
 0x326   : > { %v787_v56 = vadd.f32 %v1876_v32, %v786_v47  ;;  %v1384_v61 = vpop.eup %1383  ;;  %v758_v8 = vadd.f32 %v1908_v60, %v757_v19  ;;  %v915_v23 = vunpack.c.l.b16 %v822_v31  ;;  %v913_v62 = vunpack.c.l.b16 %v820_v13 }
 0x327   : > { %v1386_v32 = vpop.eup %1385  ;;  %v811_v48 = vpack.c.bf16 %v1384_v61, %v1384_v61  ;;  %v818_v6 = vpack.c.bf16 %v1821_v9, %v1821_v9  ;;  %v809_v33 = vpack.c.bf16 %v1380_v54, %v1380_v54  ;;  %v810_v29 = vpack.c.bf16 %v1382_v2, %v1382_v2 }
 0x328   : > { %v788_v57 = vadd.f32 %v1879_v35, %v787_v56  ;;  %942 = vmatpush.bf16.msra.mxu0 %v929_v30  ;;  %v1388_v17 = vpop.eup %1387  ;;  %v759_v18 = vadd.f32 %v1913_v53, %v758_v8  ;;  %v812_v14 = vpack.c.bf16 %v1386_v32, %v1386_v32  ;;  %v927_v40 = vpack.c.b16 %v915_v23, %v914_v22  ;;  %v750_v23 = vld [vmem:[#allocation4 + $0x1] sm:$0x1] }
 0x329   : > { %v1390_v35 = vpop.eup %1389  ;;  %v813_v27 = vpack.c.bf16 %v1388_v17, %v1388_v17  ;;  %v859_v16 = vunpack.c.l.b16 %v811_v48  ;;  %v926_v47 = vpack.c.b16 %v913_v62, %v912_v58  ;;  %v815_v4 = vpack.c.bf16 %v1808_v63, %v1808_v63 }
 0x32a   : > { %v789_v5 = vrot.slane %v788_v57, 4  ;;  %v760_v20 = vadd.f32 %v1917_v25, %v759_v18  ;;  %v814_v44 = vpack.c.bf16 %v1390_v35, %v1390_v35  ;;  %v1392_v42 = vpop.eup %1391  ;;  %v860_v11 = vunpack.c.l.b16 %v812_v14 }
 0x32b   : > { %v861_v49 = vunpack.c.l.b16 %v813_v27  ;;  %v645_v55 = vmul.f32 1.442695, %v642_v39  ;;  %v910_v51 = vunpack.c.l.b16 %v817_v36  ;;  %v911_v19 = vunpack.c.l.b16 %v818_v6 }
 0x32c   : > { %v790_v26 = vadd.f32 %v789_v5, %v788_v57  ;;  %943 = vmatpush.bf16.msra.mxu0 %v928_v21  ;;  %v761_v38 = vadd.f32 %v1392_v42, %v760_v20  ;;  %v862_v30 = vunpack.c.l.b16 %v814_v44  ;;  %v816_v9 = vpack.c.bf16 %v1811_v0, %v1811_v0 }
 0x32d   : > { %v808_v28 = vpack.c.bf16 %v1392_v42, %v1392_v42  ;;  %v869_v31 = vpack.c.b16 %v860_v11, %v859_v16  ;;  %v857_v57 = vunpack.c.l.b16 %v809_v33  ;;  %v858_v8 = vunpack.c.l.b16 %v810_v29  ;;  %v749_v16 = vld [vmem:[#allocation4] sm:$0x1] }
 0x32e   : > { %v791_v45 = vrot.slane %v790_v26, 2  ;;  %v762_v7 = vadd.f32 %v1380_v54, %v761_v38  ;;  %v870_v10 = vpack.c.b16 %v862_v30, %v861_v49  ;;  %v807_v54 = vpack.c.bf16 %v1917_v25, %v1917_v25 }
 0x32f   : > { %1393 = vpow2.f32 %v645_v55  ;;  %v908_v12 = vunpack.c.l.b16 %v815_v4  ;;  %v909_v13 = vunpack.c.l.b16 %v816_v9  ;;  %v805_v18 = vpack.c.bf16 %v1908_v60, %v1908_v60  ;;  %v954_v55 = vld [vmem:[#allocation5 + $0x8] sm:$0xff] }
 0x330   : > { %944 = vmatpush.bf16.msra.mxu0 %v927_v40  ;;  %v792_v59 = vadd.f32 %v791_v45, %v790_v26  ;;  %v763_v56 = vadd.f32 %v1382_v2, %v762_v7  ;;  %879 = vmatpush.bf16.msra.mxu3 %v870_v10  ;;  %v925_v2 = vpack.c.b16 %v911_v19, %v910_v51  ;;  %v856_v22 = vunpack.c.l.b16 %v808_v28  ;;  %v953_v28 = vld [vmem:[#allocation5] sm:$0xff] }
 0x331   : > { %v806_v0 = vpack.c.bf16 %v1913_v53, %v1913_v53  ;;  %v868_v21 = vpack.c.b16 %v858_v8, %v857_v57  ;;  %v853_v39 = vunpack.c.l.b16 %v805_v18  ;;  %v803_v44 = vpack.c.bf16 %v1901_v41, %v1901_v41 }
 0x332   : > { %v764_v34 = vadd.f32 %v1384_v61, %v763_v56  ;;  %v793_v5 = vrot.slane %v792_v59, 1  ;;  %v855_v61 = vunpack.c.l.b16 %v807_v54  ;;  %v804_v53 = vpack.c.bf16 %v1904_v1, %v1904_v1 }
 0x333   : > { %v854_v20 = vunpack.c.l.b16 %v806_v0  ;;  %v406_v14 = vpack.c.bf16 %v1713_v50, %v1713_v50  ;;  %v851_v58 = vunpack.c.l.b16 %v803_v44  ;;  %v801_v38 = vpack.c.bf16 %v1893_v37, %v1893_v37 }
 0x334   : > { %945 = vmatpush.bf16.msra.mxu0 %v926_v47  ;;  %v765_v63 = vadd.f32 %v1386_v32, %v764_v34  ;;  %880 = vmatpush.bf16.msra.mxu3 %v869_v31  ;;  %v794_v26 = vadd.f32 %v793_v5, %v792_v59  ;;  %v924_v32 = vpack.c.b16 %v909_v13, %v908_v12  ;;  %v852_v62 = vunpack.c.l.b16 %v804_v53 }
 0x335   : > { %v1394_v36 = vpop.eup %1393  ;;  %v867_v48 = vpack.c.b16 %v856_v22, %v855_v61  ;;  %v866_v49 = vpack.c.b16 %v854_v20, %v853_v39  ;;  %v802_v1 = vpack.c.bf16 %v1897_v52, %v1897_v52  ;;  %v799_v50 = vpack.c.bf16 %v1889_v15, %v1889_v15 }
 0x336   : > { %v766_v25 = vadd.f32 %v1388_v17, %v765_v63  ;;  %v752_v17 = vmul.f32 %v1394_v36, %v750_v23  ;;  %v865_v40 = vpack.c.b16 %v852_v62, %v851_v58  ;;  %v849_v6 = vunpack.c.l.b16 %v801_v38 }
 0x337   : > { %v850_v33 = vunpack.c.l.b16 %v802_v1  ;;  %v847_v7 = vunpack.c.l.b16 %v799_v50  ;;  %v958_v4 = vperm.slane %v1394_v36, 0 }
 0x338   : > { %946 = vmatpush.bf16.msra.mxu0 %v925_v2  ;;  %v767_v27 = vadd.f32 %v1390_v35, %v766_v25  ;;  %881 = vmatpush.bf16.msra.mxu3 %v868_v21  ;;  %v641_v35 = vsub.f32 %v1805_v43, %v1815_v3  ;;  %v796_v45 = vadd.f32 %v794_v26, %v752_v17 }
 0x339   : > { %v800_v43 = vpack.c.bf16 %v1891_v24, %v1891_v24  ;;  %v864_v37 = vpack.c.b16 %v850_v33, %v849_v6  ;;  %v405_v24 = vpack.c.bf16 %v1705_v46, %v1705_v46  ;;  %v962_v56 = vmul.f32 %v958_v4, %v954_v55 }
 0x33a   : > { %v768_v60 = vrot.slane %v767_v27, 4  ;;  %798 = vst [vmem:[#allocation4 + $0x1] sm:$0x1] %v796_v45  ;;  %v643_v30 = vmul.f32 1.442695, %v641_v35 }
 0x33b   : > { %v848_v10 = vunpack.c.l.b16 %v800_v43 }
 0x33c   : > { %947 = vmatpush.bf16.msra.mxu0 %v924_v32  ;;  %v769_v42 = vadd.f32 %v768_v60, %v767_v27  ;;  %882 = vmatpush.bf16.msra.mxu3 %v867_v48  ;;  %1395 = vpow2.f32 %v643_v30 }
 0x33d   : > { %v863_v59 = vpack.c.b16 %v848_v10, %v847_v7 }
 0x33e   : > { %v770_v41 = vrot.slane %v769_v42, 2 }
 0x33f   : > { %948 = vmatmul.bf16.vlgmr.msra.gmra.mxu0 %v406_v14 }
 0x340   : > { %883 = vmatpush.bf16.msra.mxu3 %v866_v49  ;;  %v771_v3 = vadd.f32 %v770_v41, %v769_v42 }
 0x342   : > { %v772_v29 = vrot.slane %v771_v3, 1  ;;  %v1396_v52 = vpop.eup %1395 }
 0x343   : > { %v751_v15 = vmul.f32 %v1396_v52, %v749_v16  ;;  %v957_v54 = vperm.slane %v1396_v52, 0 }
 0x344   : > { %884 = vmatpush.bf16.msra.mxu3 %v865_v40  ;;  %v773_v11 = vadd.f32 %v772_v29, %v771_v3 }
 0x345   : > { %v961_v34 = vmul.f32 %v957_v54, %v953_v28 }
 0x346   : > { %v795_v47 = vadd.f32 %v773_v11, %v751_v15 }
 0x348   : > { %885 = vmatpush.bf16.msra.mxu3 %v864_v37  ;;  %797 = vst [vmem:[#allocation4] sm:$0x1] %v795_v47 }
 0x34c   : > { %886 = vmatpush.bf16.msra.mxu3 %v863_v59 }
 0x34f   : > { %887 = vmatmul.bf16.vlgmr.msra.gmra.mxu3 %v405_v24 }
 0x3bc   : > { %v949_v51 = vpop.f32.mrf.mxu0 }
 0x3bd   : > { %v964_v19 = vadd.f32 %v962_v56, %v949_v51 }
 0x3bf   : > { %966 = vst [vmem:[#allocation5 + $0x8] sm:$0xff] %v964_v19 }
 0x3c4   : > { %v951_v9 = vpop.f32.mrf.mxu0 }
 0x3d2   : > { %v888_v31 = vpop.f32.mrf.mxu3 }
 0x3d3   : > { %v963_v57 = vadd.f32 %v961_v34, %v888_v31 }
 0x3d5   : > { %965 = vst [vmem:[#allocation5] sm:$0xff] %v963_v57 }
 0x3d6   : > { %972 = sbr.rel (%p1202_p3) target bundleno = 1140 (0x474), region = 52 }
 0x3da   : > { %v890_v8 = vpop.f32.mrf.mxu3 }
 0x3db   : > { %v975_v46 = vld [vmem:[#allocation4] sm:$0x1]  ;;  %v976_v5 = vld [vmem:[#allocation4 + $0x1] sm:$0x1]  ;;  %v1516_v63 = vmov 0   ;;  %v974_v25 = vld [vmem:[#allocation5 + $0x8] sm:$0xff] }
 0x3dc   : > { %1398 = vrcp.f32 %v975_v46  ;;  %1397 = vset.pattern.permute.xlu0 %v1516_v63  ;;  %v1032_v2 = vld [vmem:[%s2043_s5] sm:$0xf]  ;;  %v973_v13 = vld [vmem:[#allocation5] sm:$0xff] }
 0x3dd   : > { %1400 = vrcp.f32 %v976_v5  ;;  %1035 = vperm.xlu0 %1397, %v1032_v2   ;;  %v987_v36 = vld [vmem:[%s2042_s4] sm:$0x3]  ;;  %v988_v39 = vld [vmem:[%s2042_s4 + $0x2] sm:$0x3] }
 0x3e2   : > { %v1399_v12 = vpop.eup %1398 }
 0x3e3   : > { %v1401_v18 = vpop.eup %1400  ;;  %v981_v0 = vperm.slane %v1399_v12, 0 }
 0x3e4   : > { %v982_v21 = vperm.slane %v1401_v18, 0 }
 0x3e5   : > { %v985_v61 = vmul.f32 %v981_v0, %v973_v13 }
 0x3e6   : > { %v986_v22 = vmul.f32 %v982_v21, %v974_v25 }
 0x3e7   : > { %v989_v23 = vpack.c.bf16 %v985_v61, %v985_v61 }
 0x3e8   : > { %v990_v26 = vpack.c.bf16 %v986_v22, %v986_v22 }
 0x3e9   : > { %v995_v27 = vsel %vm450_vm4, %v989_v23, 0 }
 0x3ea   : > { %1004 = vmatpush.bf16.msra.mxu0 %v995_v27  ;;  %v1014_v32 = vsel %vm450_vm4, %v990_v26, 0 }
 0x3eb   : > { %1023 = vmatpush.bf16.msra.mxu1 %v1014_v32 }
 0x3ed   : > { %1203 = vmatmul.msk.bf16.vlgmr.msra.gmra.mxu0 %vm425_vm5, %v987_v36 }
 0x3ee   : > { %1204 = vmatmul.msk.bf16.vlgmr.msra.gmra.mxu1 %vm425_vm5, %v988_v39 }
 0x44f   : > { %v1036_v53 = vpop.permute.xlu0 %1035 }
 0x46a   : > { %v1006_v20 = vpop.f32.mrf.mxu0 }
 0x46b   : > { %v1029_v44 = vsel %vm450_vm4, %v1006_v20, 0.0  ;;  %v1025_v60 = vpop.f32.mrf.mxu1 }
 0x46c   : > { %v1030_v48 = vsel %vm450_vm4, %v1025_v60, 0.0 }
 0x46d   : > { %v1031_v17 = vadd.f32 %v1030_v48, %v1029_v44 }
 0x46f   : > { %v1038_v14 = vadd.f32 %v1036_v53, %v1031_v17 }
 0x471   : > { %1039 = vst [vmem:[%s296_s23] sm:$0xf] %v1038_v14 }
 0x472   : > { %v1008_v35 = vpop.f32.mrf.mxu0 }
 0x473   : > { %v1027_v42 = vpop.f32.mrf.mxu1 }
 0x474 PF: > { %s1206_s15 = sshll.u32 %s1496_s26, 1  ;;  %s1055_s17 = sshll.u32 %s296_s23, 4  ;;  %s1056_s17 = int_to_ptr.vmem [resolvable:$true] %s1055_s17 }
 0x475   : > { %s1051_s16 = sadd.s32 %s1492_s25, %s1206_s15  ;;  %s2062_s9 = sand.u32 1, %s1480_s22  }
 0x476   : > { %s1207_s7 = sshll.u32 %s1051_s16, 2  ;;  %s1041_s10 = scalar_lea.sflag [#allocation7], %s2062_s9 }
 0x477   : > { %s1053_s28 = scalar_lea.hbm %s2044_s6, %s1207_s7  ;;  %s1422_s23 = scalar_lea.hbm %s2044_s6, 16 }
 0x478   : > { %s1057_s29 = sshll.u32 %s1053_s28, 4  ;;  %s1058_s29 = int_to_ptr.hbm [resolvable:$true] %s1057_s29 }
 0x479   : > { %s1416_s11 = sshra.s32 %s1058_s29, 4  ;;  %s1417_s11 = int_to_ptr.hbm [resolvable:$true] %s1416_s11 }
 0x47a   : > { %s1418_s24 = scalar_lea.hbm %s1417_s11, 4  ;;  %p1423_p9 = scmp.lt.s32.totalorder %s1417_s11, %s2044_s6 }
 0x47b   : > { %p1419_p4 = scmp.ne.s32.totalorder %s1417_s11, %s1418_s24  ;;  %p1424_p10 = scmp.lt.s32.totalorder %s1422_s23, %s1418_s24 }
 0x47d   : > { %p1420_p5 = pnand %p1419_p4, %p1614_p6  ;;  %p1425_p11 = por %p1424_p10, %p1423_p9 }
 0x47f   : > { %p1421_p8 = pneg %p1420_p5 }
 0x481   : > { %p1426_p12 = pnand %p1425_p11, %p1421_p8 }
 0x483   : > { %1429 = shalt.err (!%p1426_p12)
}
 0x484   : > { %1221 = dma.vmem_to_hbm [thread:$0]  (%p1614_p6), %s1056_s17, 64, %s1058_s29, %s1041_s10  }
 0x485 PF: > { %p1227_p13 = scmp.ge.s32.totalorder %s1512_s30, 2  ;;  %s1069_s19 = sand.u32 1, %s1476_s21  }
 0x486   : > { %s1070_s14 = scalar_lea.sflag [#allocation7], %s1069_s19 }
 0x487   : > { %p1224_p0 = pnand %p1227_p13, %p1621_p7 }
 0x489   : > { %p1225_p1 = pneg %p1224_p0 }
 0x48b   : > { %1471 = dma.done.wait (%p1225_p1), %s1070_s14, 64  }
 0x48c   : > { %1473 = vsyncadd (%p1225_p1), %s1070_s14, 4294967232  ;;  %s19_s30 = sadd.s32 1, %s1512_s30   ;;  %s2063_s15 = sld [smem:[#allocation9_spill]] }
 0x48d   : > { %p16_p2 = scmp.ge.s32.totalorder %s19_s30, 10   ;;  %s2064_s23 = sld [smem:[#allocation16_spill]] }
 0x48e   : > { %s2065_s24 = sld [smem:[#allocation10_spill]]  ;;  %s2071_s21 = smov %s1480_s22 }
 0x48f   : > { %s2066_s25 = sld [smem:[#allocation11_spill]]  ;;  %18 = sbr.rel (!%p16_p2) target bundleno = 6 (0x6), region = 90 }
 0x490   : > { %s2067_s26 = sld [smem:[#allocation12_spill]] }
 0x491   : > { %s2068_s27 = sld [smem:[#allocation13_spill]] }
 0x492   : > { %s2069_s28 = sld [smem:[#allocation14_spill]]  ;;  %s2072_s22 = smov %s2063_s15 }
 0x493   : > { %s2070_s29 = sld [smem:[#allocation15_spill]] }
 0x494   :  { %1076 = vsyncpa [#allocation7], 1 }
 0x495   :  { %1078 = vsyncpa [#allocation7 + $0x1], 1 }

</bundles_post_ra>
